<compile_context>
chip_gen: v6e
topology: v6e:2x2x1
jax: 0.10.0
libtpu: 0.0.40
codegen_flags: <defaults>
</compile_context>

<pallas_src>
import numpy as np
import jax
import jax.numpy as jnp
from jax.experimental import pallas as pl
from jax.experimental.pallas import tpu as pltpu  # noqa: F401  (TPU backend)

LEAK = 0.2      # LeakyReLU negative slope
BN_EPS = 1e-5   # nn.BatchNorm2d default eps

# Static geometry: 32x32 input is the smallest spatial size compatible with the
# four stacked convs (32 -> 16 -> 8 -> 4 -> 1).
H = W = 32
S2 = 8 * 8      # per-channel spatial size after conv2
S3 = 4 * 4      # per-channel spatial size after conv3


# ------------------------------ Pallas kernel ------------------------------ #

def _leaky(y):
    return jnp.where(y >= 0.0, y, LEAK * y)


def _bn_lrelu(y, s, g, b):
    """Training-mode BatchNorm2d + LeakyReLU on an (N, 2*s) channel-major slab.

    Column layout per row: [channel-0 spatial (s) | channel-1 spatial (s)].
    Per-channel mean / var are computed for both channels in one pass via a
    small one-hot matmul (MXU), then applied with a single lane mask.
    """
    n = y.shape[0]
    cnt = float(n * s)
    # One-hot channel selector (2*s, 2) built in-register (no DMA, no division).
    row = jax.lax.broadcasted_iota(jnp.int32, (2 * s, 2), 0)
    col = jax.lax.broadcasted_iota(jnp.int32, (2 * s, 2), 1)
    chan = (row >= s).astype(jnp.int32)
    oneh = (chan == col).astype(jnp.float32)
    # Per-channel sums / sums-of-squares, both channels at once.
    ssum = jnp.dot(y, oneh, preferred_element_type=jnp.float32)        # (N, 2)
    ssq = jnp.dot(y * y, oneh, preferred_element_type=jnp.float32)     # (N, 2)
    mean = jnp.sum(ssum, axis=0, keepdims=True) * (1.0 / cnt)          # (1, 2)
    var = jnp.sum(ssq, axis=0, keepdims=True) * (1.0 / cnt) - mean * mean
    scale = g * jax.lax.rsqrt(var + BN_EPS)                            # (1, 2)
    shift = b - mean * scale                                           # (1, 2)
    # Broadcast the per-channel affine to all lanes with one channel mask.
    lane = jax.lax.broadcasted_iota(jnp.int32, (1, 2 * s), 1)
    is_c1 = lane >= s
    scale_l = jnp.where(is_c1, scale[:, 1:2], scale[:, 0:1])           # (1, 2s)
    shift_l = jnp.where(is_c1, shift[:, 1:2], shift[:, 0:1])
    return _leaky(y * scale_l + shift_l)


def _disc_zero_kernel(x_ref, e_ref, pyt_ref, w1x_ref, m2_ref, m3_ref, m4_ref,
                      bn_ref, o_ref):
    n = x_ref.shape[0]

    # x = clamp(x + edge, -1, 1)                                   (N, 32, 32)
    h0 = jnp.clip(x_ref[...] + e_ref[...], -1.0, 1.0)
    h0b = h0.astype(jnp.bfloat16)

    # ---- conv1 (1->2, k4 s2 p1) + LeakyReLU, separable form ---------------
    # Stage 1: 0/1 row-window gather.  pyt[k*16+oy, y] selects padded input
    # row y = 2*oy - 1 + k.  One batched matmul over the batch dim.
    pytb = jnp.broadcast_to(pyt_ref[...], (n,) + pyt_ref.shape)       # (N,64,32)
    r = jnp.einsum("nuy,nyx->nux", pytb, h0b,
                   preferred_element_type=jnp.float32)                # (N,64,32)
    # Stage 2: per-tap (column-gather x conv1 weight) matmuls, summed over the
    # 4 row taps.  Rows of y1 are (n, oy); lanes are (oc, ox).
    w1x = w1x_ref[...]                                                # (128,32)
    y1 = jnp.zeros((n * 16, 32), jnp.float32)
    for k in range(4):
        r_k = r[:, k * 16:(k + 1) * 16, :].reshape(n * 16, 32)
        y1 = y1 + jnp.dot(r_k.astype(jnp.bfloat16),
                          w1x[k * 32:(k + 1) * 32, :],
                          preferred_element_type=jnp.float32)         # (N*16,32)
    h1 = _leaky(y1)

    # Re-layout (N*16, 32) -> (N, 512), lane order (oy, oc, ox): leading-dim
    # reshape + last-axis concat of the 16 row groups (no minor-dim reshape).
    h1r = h1.reshape(n, 16, 32)
    h1w = jnp.concatenate([h1r[:, i, :] for i in range(16)], axis=1)  # (N, 512)

    # ---- conv2 (2->2, k4 s2 p1) + BatchNorm + LeakyReLU --------------------
    y2 = jnp.dot(h1w.astype(jnp.bfloat16), m2_ref[...],
                 preferred_element_type=jnp.float32)                  # (N, 128)
    bn = bn_ref[...]                                                  # (1, 8)
    h2 = _bn_lrelu(y2, S2, bn[:, 0:2], bn[:, 2:4])

    # ---- conv3 (2->2, k4 s2 p1) + BatchNorm + LeakyReLU --------------------
    y3 = jnp.dot(h2.astype(jnp.bfloat16), m3_ref[...],
                 preferred_element_type=jnp.float32)                  # (N, 32)
    h3 = _bn_lrelu(y3, S3, bn[:, 4:6], bn[:, 6:8])

    # ---- conv4 (2->1, k4 s1 p0) + Sigmoid: 32 -> 1 is a VPU mul + lane-reduce
    y4 = jnp.sum(h3 * m4_ref[...], axis=1, keepdims=True)             # (N, 1)
    o_ref[...] = jax.nn.sigmoid(y4)


# ------------------------------ call wrapper -------------------------------- #

def _full_spec(shape):
    return pl.BlockSpec(shape, lambda *_: (0,) * len(shape))


def disc_zero_forward(x_nchw, edge_nchw, prepped):
    n = x_nchw.shape[0]
    x = x_nchw.reshape(n, H, W)        # no-copy squeeze of the channel dim
    e = edge_nchw.reshape(n, H, W)
    args = (x, e, prepped["pyt"], prepped["w1x"], prepped["m2"], prepped["m3"],
            prepped["m4"], prepped["bn"])
    out = pl.pallas_call(
        _disc_zero_kernel,
        out_shape=jax.ShapeDtypeStruct((n, 1), jnp.float32),
        in_specs=[_full_spec(a.shape) for a in args],
        out_specs=_full_spec((n, 1)),
    )(*args)
    return out.reshape(n, 1, 1, 1)     # back to NCHW (N, 1, 1, 1)


# --------------------- one-time parameter preparation ----------------------- #

def _axis_gather(size, ksz, stride, pad, osize):
    """p[t, i, o] = 1 iff input index i == stride*o - pad + t (and 0 <= i < size)."""
    p = np.zeros((ksz, size, osize), np.float32)
    for t in range(ksz):
        for o in range(osize):
            i = stride * o - pad + t
            if 0 <= i < size:
                p[t, i, o] = 1.0
    return p


def _conv_dense_matrix(w, h, wd, stride, pad, in_order="chw"):
    """Fold a conv weight (OC, IC, KH, KW) into a dense matrix mapping the
    flattened input (rows: 'chw' -> (ic, y, x), 'hcw' -> (y, ic, x)) to the
    flattened channel-major output (oc, oy, ox).  Runs once on the host."""
    w = np.asarray(w, np.float32)
    oc, ic, kh, kw = w.shape
    oh = (h + 2 * pad - kh) // stride + 1
    ow = (wd + 2 * pad - kw) // stride + 1
    py = _axis_gather(h, kh, stride, pad, oh)    # (kh, h, oh)
    px = _axis_gather(wd, kw, stride, pad, ow)   # (kw, wd, ow)
    sub = "iyx" if in_order == "chw" else "yix"
    m = np.einsum(f"oikl,kyu,lxv->{sub}ouv", w, py, px)
    return m.reshape(ic * h * wd, oc * oh * ow)


def prepare_params(params):
    w1 = np.asarray(params["w1"], np.float32)                  # (2, 1, 4, 4)
    py = _axis_gather(H, 4, 2, 1, 16)                          # (4, 32, 16)
    px = _axis_gather(W, 4, 2, 1, 16)                          # (4, 32, 16)
    # Row-window gather operator: pyt[k*16 + oy, y] = py[k, y, oy].
    pyt = np.transpose(py, (0, 2, 1)).reshape(64, 32)
    # Per-tap conv1 weights x column gather: w1x[k*32 + ix, oc*16 + ox].
    w1x = np.einsum("okl,lxv->kxov", w1[:, 0], px).reshape(128, 32)
    # conv2 folded for the (oy, oc, ox)-ordered 512-wide conv1 activation.
    m2 = _conv_dense_matrix(params["w2"], 16, 16, 2, 1, in_order="hcw")  # (512,128)
    m3 = _conv_dense_matrix(params["w3"], 8, 8, 2, 1, in_order="chw")    # (128, 32)
    m4 = _conv_dense_matrix(params["w4"], 4, 4, 1, 0, in_order="chw").T  # (1, 32)
    bn = np.concatenate([np.asarray(params["g2"], np.float32).ravel(),
                         np.asarray(params["b2"], np.float32).ravel(),
                         np.asarray(params["g3"], np.float32).ravel(),
                         np.asarray(params["b3"], np.float32).ravel()]).reshape(1, 8)
    return {
        "pyt": jnp.asarray(pyt, jnp.bfloat16),   # (64, 32)  0/1 gather (exact in bf16)
        "w1x": jnp.asarray(w1x, jnp.bfloat16),   # (128, 32)
        "m2": jnp.asarray(m2, jnp.bfloat16),     # (512, 128)
        "m3": jnp.asarray(m3, jnp.bfloat16),     # (128, 32)
        "m4": jnp.asarray(m4, jnp.float32),      # (1, 32)   used on the VPU, keep f32
        "bn": jnp.asarray(bn, jnp.float32),      # (1, 8) = [g2 | b2 | g3 | b3]
    }


def init_params(key):
    k1, k2, k3, k4 = jax.random.split(key, 4)
    # PyTorch conv weight shapes: (OC, IC, KH, KW); BN default weight=1, bias=0.
    return {
        "w1": 0.1 * jax.random.normal(k1, (2, 1, 4, 4), jnp.float32),
        "w2": 0.1 * jax.random.normal(k2, (2, 2, 4, 4), jnp.float32),
        "w3": 0.1 * jax.random.normal(k3, (2, 2, 4, 4), jnp.float32),
        "w4": 0.1 * jax.random.normal(k4, (1, 2, 4, 4), jnp.float32),
        "g2": jnp.ones((1, 2), jnp.float32),
        "b2": jnp.zeros((1, 2), jnp.float32),
        "g3": jnp.ones((1, 2), jnp.float32),
        "b3": jnp.zeros((1, 2), jnp.float32),
    }


if __name__ == "__main__":
    key = jax.random.PRNGKey(0)
    kx, ke, kp = jax.random.split(key, 3)
    # 32x32 single-channel inputs, batch = 2.
    x = jax.random.normal(kx, (2, 1, 32, 32), jnp.float32)
    edge = jax.random.normal(ke, (2, 1, 32, 32), jnp.float32)
    params = init_params(kp)
    prepped = prepare_params(params)          # one-time host-side weight folding

    out = jax.jit(disc_zero_forward)(x, edge, prepped)
    out = jax.block_until_ready(out)
    assert out.shape == (2, 1, 1, 1)
    assert bool(jnp.all((out >= 0.0) & (out <= 1.0)))
    print("KERNEL_OK")
</pallas_src>

<mosaic_0001>
module attributes {stable_mosaic.version = 11 : i64} {
  func.func @_disc_zero_kernel(%arg0: memref<2x32x32xf32, #tpu.memory_space<vmem>>, %arg1: memref<2x32x32xf32, #tpu.memory_space<vmem>>, %arg2: memref<64x32xbf16, #tpu.memory_space<vmem>>, %arg3: memref<128x32xbf16, #tpu.memory_space<vmem>>, %arg4: memref<512x128xbf16, #tpu.memory_space<vmem>>, %arg5: memref<128x32xbf16, #tpu.memory_space<vmem>>, %arg6: memref<1x32xf32, #tpu.memory_space<vmem>>, %arg7: memref<1x8xf32, #tpu.memory_space<vmem>>, %arg8: memref<2x1xf32, #tpu.memory_space<vmem>>) attributes {dimension_semantics = [], scalar_prefetch = 0 : i64, scratch_operands = 0 : i64, tpu.core_type = #tpu.core_type<tc>} {
    %c0 = arith.constant 0 : index
    %c0_0 = arith.constant 0 : index
    %c0_1 = arith.constant 0 : index
    %0 = vector.load %arg0[%c0, %c0_0, %c0_1] : memref<2x32x32xf32, #tpu.memory_space<vmem>>, vector<2x32x32xf32>
    %c0_2 = arith.constant 0 : index
    %c0_3 = arith.constant 0 : index
    %c0_4 = arith.constant 0 : index
    %1 = vector.load %arg1[%c0_2, %c0_3, %c0_4] : memref<2x32x32xf32, #tpu.memory_space<vmem>>, vector<2x32x32xf32>
    %2 = arith.addf %0, %1 : vector<2x32x32xf32>
    %cst = arith.constant -1.000000e+00 : f32
    %cst_5 = arith.constant 1.000000e+00 : f32
    %3 = vector.broadcast %cst : f32 to vector<2x32x32xf32>
    %4 = arith.maximumf %3, %2 : vector<2x32x32xf32>
    %5 = vector.broadcast %cst_5 : f32 to vector<2x32x32xf32>
    %6 = arith.minimumf %5, %4 : vector<2x32x32xf32>
    %7 = arith.truncf %6 : vector<2x32x32xf32> to vector<2x32x32xbf16>
    %c0_6 = arith.constant 0 : index
    %c0_7 = arith.constant 0 : index
    %8 = vector.load %arg2[%c0_6, %c0_7] : memref<64x32xbf16, #tpu.memory_space<vmem>>, vector<64x32xbf16>
    %9 = vector.shape_cast %8 : vector<64x32xbf16> to vector<1x64x32xbf16>
    %10 = vector.broadcast %9 : vector<1x64x32xbf16> to vector<2x64x32xbf16>
    "tpu.trace_start"() <{level = 10 : i32, message = "nuy,nyx->nux"}> : () -> ()
    %cst_8 = arith.constant dense<0.000000e+00> : vector<2x64x32xf32>
    %11 = tpu.matmul %10, %7, %cst_8 {dimension_numbers = #tpu.dot_dimension_numbers<[2], [1], [1], [2], [0, 0, 0, 1, 1, 2], [0], [0]>} : vector<2x64x32xbf16>, vector<2x32x32xbf16>, vector<2x64x32xf32> -> vector<2x64x32xf32>
    "tpu.trace_stop"() : () -> ()
    %c0_9 = arith.constant 0 : index
    %c0_10 = arith.constant 0 : index
    %12 = vector.load %arg3[%c0_9, %c0_10] : memref<128x32xbf16, #tpu.memory_space<vmem>>, vector<128x32xbf16>
    %cst_11 = arith.constant 0.000000e+00 : f32
    %13 = vector.broadcast %cst_11 : f32 to vector<32x32xf32>
    %14 = vector.extract_strided_slice %11 {offsets = [0, 0, 0], sizes = [2, 16, 32], strides = [1, 1, 1]} : vector<2x64x32xf32> to vector<2x16x32xf32>
    %15 = vector.shape_cast %14 : vector<2x16x32xf32> to vector<32x32xf32>
    %16 = arith.truncf %15 : vector<32x32xf32> to vector<32x32xbf16>
    %17 = vector.extract_strided_slice %12 {offsets = [0, 0], sizes = [32, 32], strides = [1, 1]} : vector<128x32xbf16> to vector<32x32xbf16>
    %cst_12 = arith.constant dense<0.000000e+00> : vector<32x32xf32>
    %18 = tpu.matmul %16, %17, %cst_12 {dimension_numbers = #tpu.dot_dimension_numbers<[1], [0], [0], [1], [0, 0, 1, 1], [], []>} : vector<32x32xbf16>, vector<32x32xbf16>, vector<32x32xf32> -> vector<32x32xf32>
    %19 = arith.addf %13, %18 : vector<32x32xf32>
    %20 = vector.extract_strided_slice %11 {offsets = [0, 16, 0], sizes = [2, 16, 32], strides = [1, 1, 1]} : vector<2x64x32xf32> to vector<2x16x32xf32>
    %21 = vector.shape_cast %20 : vector<2x16x32xf32> to vector<32x32xf32>
    %22 = arith.truncf %21 : vector<32x32xf32> to vector<32x32xbf16>
    %23 = vector.extract_strided_slice %12 {offsets = [32, 0], sizes = [32, 32], strides = [1, 1]} : vector<128x32xbf16> to vector<32x32xbf16>
    %cst_13 = arith.constant dense<0.000000e+00> : vector<32x32xf32>
    %24 = tpu.matmul %22, %23, %cst_13 {dimension_numbers = #tpu.dot_dimension_numbers<[1], [0], [0], [1], [0, 0, 1, 1], [], []>} : vector<32x32xbf16>, vector<32x32xbf16>, vector<32x32xf32> -> vector<32x32xf32>
    %25 = arith.addf %19, %24 : vector<32x32xf32>
    %26 = vector.extract_strided_slice %11 {offsets = [0, 32, 0], sizes = [2, 16, 32], strides = [1, 1, 1]} : vector<2x64x32xf32> to vector<2x16x32xf32>
    %27 = vector.shape_cast %26 : vector<2x16x32xf32> to vector<32x32xf32>
    %28 = arith.truncf %27 : vector<32x32xf32> to vector<32x32xbf16>
    %29 = vector.extract_strided_slice %12 {offsets = [64, 0], sizes = [32, 32], strides = [1, 1]} : vector<128x32xbf16> to vector<32x32xbf16>
    %cst_14 = arith.constant dense<0.000000e+00> : vector<32x32xf32>
    %30 = tpu.matmul %28, %29, %cst_14 {dimension_numbers = #tpu.dot_dimension_numbers<[1], [0], [0], [1], [0, 0, 1, 1], [], []>} : vector<32x32xbf16>, vector<32x32xbf16>, vector<32x32xf32> -> vector<32x32xf32>
    %31 = arith.addf %25, %30 : vector<32x32xf32>
    %32 = vector.extract_strided_slice %11 {offsets = [0, 48, 0], sizes = [2, 16, 32], strides = [1, 1, 1]} : vector<2x64x32xf32> to vector<2x16x32xf32>
    %33 = vector.shape_cast %32 : vector<2x16x32xf32> to vector<32x32xf32>
    %34 = arith.truncf %33 : vector<32x32xf32> to vector<32x32xbf16>
    %35 = vector.extract_strided_slice %12 {offsets = [96, 0], sizes = [32, 32], strides = [1, 1]} : vector<128x32xbf16> to vector<32x32xbf16>
    %cst_15 = arith.constant dense<0.000000e+00> : vector<32x32xf32>
    %36 = tpu.matmul %34, %35, %cst_15 {dimension_numbers = #tpu.dot_dimension_numbers<[1], [0], [0], [1], [0, 0, 1, 1], [], []>} : vector<32x32xbf16>, vector<32x32xbf16>, vector<32x32xf32> -> vector<32x32xf32>
    %37 = arith.addf %31, %36 : vector<32x32xf32>
    %cst_16 = arith.constant 0.000000e+00 : f32
    %38 = vector.broadcast %cst_16 : f32 to vector<32x32xf32>
    %39 = arith.cmpf oge, %37, %38 : vector<32x32xf32>
    %cst_17 = arith.constant 2.000000e-01 : f32
    %40 = vector.broadcast %cst_17 : f32 to vector<32x32xf32>
    %41 = arith.mulf %40, %37 : vector<32x32xf32>
    %42 = arith.select %39, %37, %41 : vector<32x32xi1>, vector<32x32xf32>
    %43 = vector.shape_cast %42 : vector<32x32xf32> to vector<2x16x32xf32>
    %44 = vector.extract_strided_slice %43 {offsets = [0, 0, 0], sizes = [2, 1, 32], strides = [1, 1, 1]} : vector<2x16x32xf32> to vector<2x1x32xf32>
    %45 = vector.shape_cast %44 : vector<2x1x32xf32> to vector<2x32xf32>
    %46 = vector.extract_strided_slice %43 {offsets = [0, 1, 0], sizes = [2, 1, 32], strides = [1, 1, 1]} : vector<2x16x32xf32> to vector<2x1x32xf32>
    %47 = vector.shape_cast %46 : vector<2x1x32xf32> to vector<2x32xf32>
    %48 = vector.extract_strided_slice %43 {offsets = [0, 2, 0], sizes = [2, 1, 32], strides = [1, 1, 1]} : vector<2x16x32xf32> to vector<2x1x32xf32>
    %49 = vector.shape_cast %48 : vector<2x1x32xf32> to vector<2x32xf32>
    %50 = vector.extract_strided_slice %43 {offsets = [0, 3, 0], sizes = [2, 1, 32], strides = [1, 1, 1]} : vector<2x16x32xf32> to vector<2x1x32xf32>
    %51 = vector.shape_cast %50 : vector<2x1x32xf32> to vector<2x32xf32>
    %52 = vector.extract_strided_slice %43 {offsets = [0, 4, 0], sizes = [2, 1, 32], strides = [1, 1, 1]} : vector<2x16x32xf32> to vector<2x1x32xf32>
    %53 = vector.shape_cast %52 : vector<2x1x32xf32> to vector<2x32xf32>
    %54 = vector.extract_strided_slice %43 {offsets = [0, 5, 0], sizes = [2, 1, 32], strides = [1, 1, 1]} : vector<2x16x32xf32> to vector<2x1x32xf32>
    %55 = vector.shape_cast %54 : vector<2x1x32xf32> to vector<2x32xf32>
    %56 = vector.extract_strided_slice %43 {offsets = [0, 6, 0], sizes = [2, 1, 32], strides = [1, 1, 1]} : vector<2x16x32xf32> to vector<2x1x32xf32>
    %57 = vector.shape_cast %56 : vector<2x1x32xf32> to vector<2x32xf32>
    %58 = vector.extract_strided_slice %43 {offsets = [0, 7, 0], sizes = [2, 1, 32], strides = [1, 1, 1]} : vector<2x16x32xf32> to vector<2x1x32xf32>
    %59 = vector.shape_cast %58 : vector<2x1x32xf32> to vector<2x32xf32>
    %60 = vector.extract_strided_slice %43 {offsets = [0, 8, 0], sizes = [2, 1, 32], strides = [1, 1, 1]} : vector<2x16x32xf32> to vector<2x1x32xf32>
    %61 = vector.shape_cast %60 : vector<2x1x32xf32> to vector<2x32xf32>
    %62 = vector.extract_strided_slice %43 {offsets = [0, 9, 0], sizes = [2, 1, 32], strides = [1, 1, 1]} : vector<2x16x32xf32> to vector<2x1x32xf32>
    %63 = vector.shape_cast %62 : vector<2x1x32xf32> to vector<2x32xf32>
    %64 = vector.extract_strided_slice %43 {offsets = [0, 10, 0], sizes = [2, 1, 32], strides = [1, 1, 1]} : vector<2x16x32xf32> to vector<2x1x32xf32>
    %65 = vector.shape_cast %64 : vector<2x1x32xf32> to vector<2x32xf32>
    %66 = vector.extract_strided_slice %43 {offsets = [0, 11, 0], sizes = [2, 1, 32], strides = [1, 1, 1]} : vector<2x16x32xf32> to vector<2x1x32xf32>
    %67 = vector.shape_cast %66 : vector<2x1x32xf32> to vector<2x32xf32>
    %68 = vector.extract_strided_slice %43 {offsets = [0, 12, 0], sizes = [2, 1, 32], strides = [1, 1, 1]} : vector<2x16x32xf32> to vector<2x1x32xf32>
    %69 = vector.shape_cast %68 : vector<2x1x32xf32> to vector<2x32xf32>
    %70 = vector.extract_strided_slice %43 {offsets = [0, 13, 0], sizes = [2, 1, 32], strides = [1, 1, 1]} : vector<2x16x32xf32> to vector<2x1x32xf32>
    %71 = vector.shape_cast %70 : vector<2x1x32xf32> to vector<2x32xf32>
    %72 = vector.extract_strided_slice %43 {offsets = [0, 14, 0], sizes = [2, 1, 32], strides = [1, 1, 1]} : vector<2x16x32xf32> to vector<2x1x32xf32>
    %73 = vector.shape_cast %72 : vector<2x1x32xf32> to vector<2x32xf32>
    %74 = vector.extract_strided_slice %43 {offsets = [0, 15, 0], sizes = [2, 1, 32], strides = [1, 1, 1]} : vector<2x16x32xf32> to vector<2x1x32xf32>
    %75 = vector.shape_cast %74 : vector<2x1x32xf32> to vector<2x32xf32>
    %76 = tpu.concatenate %45, %47, %49, %51, %53, %55, %57, %59, %61, %63, %65, %67, %69, %71, %73, %75 in 1 : vector<2x32xf32>, vector<2x32xf32>, vector<2x32xf32>, vector<2x32xf32>, vector<2x32xf32>, vector<2x32xf32>, vector<2x32xf32>, vector<2x32xf32>, vector<2x32xf32>, vector<2x32xf32>, vector<2x32xf32>, vector<2x32xf32>, vector<2x32xf32>, vector<2x32xf32>, vector<2x32xf32>, vector<2x32xf32> -> vector<2x512xf32>
    %77 = arith.truncf %76 : vector<2x512xf32> to vector<2x512xbf16>
    %c0_18 = arith.constant 0 : index
    %c0_19 = arith.constant 0 : index
    %78 = vector.load %arg4[%c0_18, %c0_19] : memref<512x128xbf16, #tpu.memory_space<vmem>>, vector<512x128xbf16>
    %cst_20 = arith.constant dense<0.000000e+00> : vector<2x128xf32>
    %79 = tpu.matmul %77, %78, %cst_20 {dimension_numbers = #tpu.dot_dimension_numbers<[1], [0], [0], [1], [0, 0, 1, 1], [], []>} : vector<2x512xbf16>, vector<512x128xbf16>, vector<2x128xf32> -> vector<2x128xf32>
    %c0_21 = arith.constant 0 : index
    %c0_22 = arith.constant 0 : index
    %80 = vector.load %arg7[%c0_21, %c0_22] : memref<1x8xf32, #tpu.memory_space<vmem>>, vector<1x8xf32>
    %81 = vector.extract_strided_slice %80 {offsets = [0, 0], sizes = [1, 2], strides = [1, 1]} : vector<1x8xf32> to vector<1x2xf32>
    %82 = vector.extract_strided_slice %80 {offsets = [0, 2], sizes = [1, 2], strides = [1, 1]} : vector<1x8xf32> to vector<1x2xf32>
    %83 = tpu.iota {dimensions = array<i32: 0>} : vector<128x2xi32>
    %84 = tpu.iota {dimensions = array<i32: 1>} : vector<128x2xi32>
    %c64_i32 = arith.constant 64 : i32
    %85 = vector.broadcast %c64_i32 : i32 to vector<128x2xi32>
    %86 = arith.cmpi sge, %83, %85 : vector<128x2xi32>
    %87 = arith.extui %86 : vector<128x2xi1> to vector<128x2xi32>
    %88 = arith.cmpi eq, %87, %84 : vector<128x2xi32>
    %89 = arith.extui %88 : vector<128x2xi1> to vector<128x2xi32>
    %90 = arith.sitofp %89 : vector<128x2xi32> to vector<128x2xf32>
    %cst_23 = arith.constant dense<0.000000e+00> : vector<2x2xf32>
    %91 = tpu.matmul %79, %90, %cst_23 {dimension_numbers = #tpu.dot_dimension_numbers<[1], [0], [0], [1], [0, 0, 1, 1], [], []>} : vector<2x128xf32>, vector<128x2xf32>, vector<2x2xf32> -> vector<2x2xf32>
    %92 = arith.mulf %79, %79 : vector<2x128xf32>
    %cst_24 = arith.constant dense<0.000000e+00> : vector<2x2xf32>
    %93 = tpu.matmul %92, %90, %cst_24 {dimension_numbers = #tpu.dot_dimension_numbers<[1], [0], [0], [1], [0, 0, 1, 1], [], []>} : vector<2x128xf32>, vector<128x2xf32>, vector<2x2xf32> -> vector<2x2xf32>
    %cst_25 = arith.constant dense<0.000000e+00> : vector<2xf32>
    %94 = vector.multi_reduction <add>, %91, %cst_25 [0] : vector<2x2xf32> to vector<2xf32>
    %95 = vector.shape_cast %94 : vector<2xf32> to vector<1x2xf32>
    %cst_26 = arith.constant 7.812500e-03 : f32
    %96 = vector.broadcast %cst_26 : f32 to vector<1x2xf32>
    %97 = arith.mulf %95, %96 : vector<1x2xf32>
    %cst_27 = arith.constant dense<0.000000e+00> : vector<2xf32>
    %98 = vector.multi_reduction <add>, %93, %cst_27 [0] : vector<2x2xf32> to vector<2xf32>
    %99 = vector.shape_cast %98 : vector<2xf32> to vector<1x2xf32>
    %cst_28 = arith.constant 7.812500e-03 : f32
    %100 = vector.broadcast %cst_28 : f32 to vector<1x2xf32>
    %101 = arith.mulf %99, %100 : vector<1x2xf32>
    %102 = arith.mulf %97, %97 : vector<1x2xf32>
    %103 = arith.subf %101, %102 : vector<1x2xf32>
    %cst_29 = arith.constant 9.99999974E-6 : f32
    %104 = vector.broadcast %cst_29 : f32 to vector<1x2xf32>
    %105 = arith.addf %103, %104 : vector<1x2xf32>
    %106 = math.rsqrt %105 : vector<1x2xf32>
    %107 = arith.mulf %81, %106 : vector<1x2xf32>
    %108 = arith.mulf %97, %107 : vector<1x2xf32>
    %109 = arith.subf %82, %108 : vector<1x2xf32>
    %110 = tpu.iota {dimensions = array<i32: 1>} : vector<1x128xi32>
    %c64_i32_30 = arith.constant 64 : i32
    %111 = vector.broadcast %c64_i32_30 : i32 to vector<1x128xi32>
    %112 = arith.cmpi sge, %110, %111 : vector<1x128xi32>
    %113 = vector.extract_strided_slice %107 {offsets = [0, 1], sizes = [1, 1], strides = [1, 1]} : vector<1x2xf32> to vector<1x1xf32>
    %114 = vector.extract_strided_slice %107 {offsets = [0, 0], sizes = [1, 1], strides = [1, 1]} : vector<1x2xf32> to vector<1x1xf32>
    %115 = vector.shape_cast %113 : vector<1x1xf32> to vector<1x1xf32>
    %116 = vector.broadcast %115 : vector<1x1xf32> to vector<1x128xf32>
    %117 = vector.shape_cast %114 : vector<1x1xf32> to vector<1x1xf32>
    %118 = vector.broadcast %117 : vector<1x1xf32> to vector<1x128xf32>
    %119 = arith.select %112, %116, %118 : vector<1x128xi1>, vector<1x128xf32>
    %120 = vector.extract_strided_slice %109 {offsets = [0, 1], sizes = [1, 1], strides = [1, 1]} : vector<1x2xf32> to vector<1x1xf32>
    %121 = vector.extract_strided_slice %109 {offsets = [0, 0], sizes = [1, 1], strides = [1, 1]} : vector<1x2xf32> to vector<1x1xf32>
    %122 = vector.shape_cast %120 : vector<1x1xf32> to vector<1x1xf32>
    %123 = vector.broadcast %122 : vector<1x1xf32> to vector<1x128xf32>
    %124 = vector.shape_cast %121 : vector<1x1xf32> to vector<1x1xf32>
    %125 = vector.broadcast %124 : vector<1x1xf32> to vector<1x128xf32>
    %126 = arith.select %112, %123, %125 : vector<1x128xi1>, vector<1x128xf32>
    %127 = vector.broadcast %119 : vector<1x128xf32> to vector<2x128xf32>
    %128 = arith.mulf %79, %127 : vector<2x128xf32>
    %129 = vector.broadcast %126 : vector<1x128xf32> to vector<2x128xf32>
    %130 = arith.addf %128, %129 : vector<2x128xf32>
    %cst_31 = arith.constant 0.000000e+00 : f32
    %131 = vector.broadcast %cst_31 : f32 to vector<2x128xf32>
    %132 = arith.cmpf oge, %130, %131 : vector<2x128xf32>
    %cst_32 = arith.constant 2.000000e-01 : f32
    %133 = vector.broadcast %cst_32 : f32 to vector<2x128xf32>
    %134 = arith.mulf %133, %130 : vector<2x128xf32>
    %135 = arith.select %132, %130, %134 : vector<2x128xi1>, vector<2x128xf32>
    %136 = arith.truncf %135 : vector<2x128xf32> to vector<2x128xbf16>
    %c0_33 = arith.constant 0 : index
    %c0_34 = arith.constant 0 : index
    %137 = vector.load %arg5[%c0_33, %c0_34] : memref<128x32xbf16, #tpu.memory_space<vmem>>, vector<128x32xbf16>
    %cst_35 = arith.constant dense<0.000000e+00> : vector<2x32xf32>
    %138 = tpu.matmul %136, %137, %cst_35 {dimension_numbers = #tpu.dot_dimension_numbers<[1], [0], [0], [1], [0, 0, 1, 1], [], []>} : vector<2x128xbf16>, vector<128x32xbf16>, vector<2x32xf32> -> vector<2x32xf32>
    %139 = vector.extract_strided_slice %80 {offsets = [0, 4], sizes = [1, 2], strides = [1, 1]} : vector<1x8xf32> to vector<1x2xf32>
    %140 = vector.extract_strided_slice %80 {offsets = [0, 6], sizes = [1, 2], strides = [1, 1]} : vector<1x8xf32> to vector<1x2xf32>
    %141 = tpu.iota {dimensions = array<i32: 0>} : vector<32x2xi32>
    %142 = tpu.iota {dimensions = array<i32: 1>} : vector<32x2xi32>
    %c16_i32 = arith.constant 16 : i32
    %143 = vector.broadcast %c16_i32 : i32 to vector<32x2xi32>
    %144 = arith.cmpi sge, %141, %143 : vector<32x2xi32>
    %145 = arith.extui %144 : vector<32x2xi1> to vector<32x2xi32>
    %146 = arith.cmpi eq, %145, %142 : vector<32x2xi32>
    %147 = arith.extui %146 : vector<32x2xi1> to vector<32x2xi32>
    %148 = arith.sitofp %147 : vector<32x2xi32> to vector<32x2xf32>
    %cst_36 = arith.constant dense<0.000000e+00> : vector<2x2xf32>
    %149 = tpu.matmul %138, %148, %cst_36 {dimension_numbers = #tpu.dot_dimension_numbers<[1], [0], [0], [1], [0, 0, 1, 1], [], []>} : vector<2x32xf32>, vector<32x2xf32>, vector<2x2xf32> -> vector<2x2xf32>
    %150 = arith.mulf %138, %138 : vector<2x32xf32>
    %cst_37 = arith.constant dense<0.000000e+00> : vector<2x2xf32>
    %151 = tpu.matmul %150, %148, %cst_37 {dimension_numbers = #tpu.dot_dimension_numbers<[1], [0], [0], [1], [0, 0, 1, 1], [], []>} : vector<2x32xf32>, vector<32x2xf32>, vector<2x2xf32> -> vector<2x2xf32>
    %cst_38 = arith.constant dense<0.000000e+00> : vector<2xf32>
    %152 = vector.multi_reduction <add>, %149, %cst_38 [0] : vector<2x2xf32> to vector<2xf32>
    %153 = vector.shape_cast %152 : vector<2xf32> to vector<1x2xf32>
    %cst_39 = arith.constant 3.125000e-02 : f32
    %154 = vector.broadcast %cst_39 : f32 to vector<1x2xf32>
    %155 = arith.mulf %153, %154 : vector<1x2xf32>
    %cst_40 = arith.constant dense<0.000000e+00> : vector<2xf32>
    %156 = vector.multi_reduction <add>, %151, %cst_40 [0] : vector<2x2xf32> to vector<2xf32>
    %157 = vector.shape_cast %156 : vector<2xf32> to vector<1x2xf32>
    %cst_41 = arith.constant 3.125000e-02 : f32
    %158 = vector.broadcast %cst_41 : f32 to vector<1x2xf32>
    %159 = arith.mulf %157, %158 : vector<1x2xf32>
    %160 = arith.mulf %155, %155 : vector<1x2xf32>
    %161 = arith.subf %159, %160 : vector<1x2xf32>
    %cst_42 = arith.constant 9.99999974E-6 : f32
    %162 = vector.broadcast %cst_42 : f32 to vector<1x2xf32>
    %163 = arith.addf %161, %162 : vector<1x2xf32>
    %164 = math.rsqrt %163 : vector<1x2xf32>
    %165 = arith.mulf %139, %164 : vector<1x2xf32>
    %166 = arith.mulf %155, %165 : vector<1x2xf32>
    %167 = arith.subf %140, %166 : vector<1x2xf32>
    %168 = tpu.iota {dimensions = array<i32: 1>} : vector<1x32xi32>
    %c16_i32_43 = arith.constant 16 : i32
    %169 = vector.broadcast %c16_i32_43 : i32 to vector<1x32xi32>
    %170 = arith.cmpi sge, %168, %169 : vector<1x32xi32>
    %171 = vector.extract_strided_slice %165 {offsets = [0, 1], sizes = [1, 1], strides = [1, 1]} : vector<1x2xf32> to vector<1x1xf32>
    %172 = vector.extract_strided_slice %165 {offsets = [0, 0], sizes = [1, 1], strides = [1, 1]} : vector<1x2xf32> to vector<1x1xf32>
    %173 = vector.shape_cast %171 : vector<1x1xf32> to vector<1x1xf32>
    %174 = vector.broadcast %173 : vector<1x1xf32> to vector<1x32xf32>
    %175 = vector.shape_cast %172 : vector<1x1xf32> to vector<1x1xf32>
    %176 = vector.broadcast %175 : vector<1x1xf32> to vector<1x32xf32>
    %177 = arith.select %170, %174, %176 : vector<1x32xi1>, vector<1x32xf32>
    %178 = vector.extract_strided_slice %167 {offsets = [0, 1], sizes = [1, 1], strides = [1, 1]} : vector<1x2xf32> to vector<1x1xf32>
    %179 = vector.extract_strided_slice %167 {offsets = [0, 0], sizes = [1, 1], strides = [1, 1]} : vector<1x2xf32> to vector<1x1xf32>
    %180 = vector.shape_cast %178 : vector<1x1xf32> to vector<1x1xf32>
    %181 = vector.broadcast %180 : vector<1x1xf32> to vector<1x32xf32>
    %182 = vector.shape_cast %179 : vector<1x1xf32> to vector<1x1xf32>
    %183 = vector.broadcast %182 : vector<1x1xf32> to vector<1x32xf32>
    %184 = arith.select %170, %181, %183 : vector<1x32xi1>, vector<1x32xf32>
    %185 = vector.broadcast %177 : vector<1x32xf32> to vector<2x32xf32>
    %186 = arith.mulf %138, %185 : vector<2x32xf32>
    %187 = vector.broadcast %184 : vector<1x32xf32> to vector<2x32xf32>
    %188 = arith.addf %186, %187 : vector<2x32xf32>
    %cst_44 = arith.constant 0.000000e+00 : f32
    %189 = vector.broadcast %cst_44 : f32 to vector<2x32xf32>
    %190 = arith.cmpf oge, %188, %189 : vector<2x32xf32>
    %cst_45 = arith.constant 2.000000e-01 : f32
    %191 = vector.broadcast %cst_45 : f32 to vector<2x32xf32>
    %192 = arith.mulf %191, %188 : vector<2x32xf32>
    %193 = arith.select %190, %188, %192 : vector<2x32xi1>, vector<2x32xf32>
    %c0_46 = arith.constant 0 : index
    %c0_47 = arith.constant 0 : index
    %194 = vector.load %arg6[%c0_46, %c0_47] : memref<1x32xf32, #tpu.memory_space<vmem>>, vector<1x32xf32>
    %195 = vector.broadcast %194 : vector<1x32xf32> to vector<2x32xf32>
    %196 = arith.mulf %193, %195 : vector<2x32xf32>
    %cst_48 = arith.constant dense<0.000000e+00> : vector<2xf32>
    %197 = vector.multi_reduction <add>, %196, %cst_48 [1] : vector<2x32xf32> to vector<2xf32>
    %198 = vector.shape_cast %197 : vector<2xf32> to vector<2x1xf32>
    %199 = arith.negf %198 : vector<2x1xf32>
    %200 = math.exp %199 : vector<2x1xf32>
    %cst_49 = arith.constant 1.000000e+00 : f32
    %201 = vector.broadcast %cst_49 : f32 to vector<2x1xf32>
    %202 = arith.addf %201, %200 : vector<2x1xf32>
    %203 = arith.divf %201, %202 : vector<2x1xf32>
    %c0_50 = arith.constant 0 : index
    %c0_51 = arith.constant 0 : index
    %204 = vector.load %arg8[%c0_50, %c0_51] : memref<2x1xf32, #tpu.memory_space<vmem>>, vector<2x1xf32>
    tpu.vector_store %arg8[%c0_50, %c0_51], %203 {strides = array<i32>} : memref<2x1xf32, #tpu.memory_space<vmem>>, vector<2x1xf32>,
    return
  }
}

</mosaic_0001>

<bundles_post_ra>
// kernel: disc_zero_forward.1
= control target key start
LH: loop header
LB: loop body
LE: loop exit
PB: predicated region body
PF: predicated region fallthrough
CT: control target
= control target key end

     0   :  { %13 = vsyncpa [#allocation3], 0  ;;  %s2342_s27 = smov [#allocation2]   ;;  %s2834_s0 = inlined_call_operand.vmem [shape: f32[2,32,32], index: 0, kind: input, shape index: {}]   ;;  %s2835_s1 = inlined_call_operand.vmem [shape: f32[2,32,32], index: 1, kind: input, shape index: {}]   ;;  %s2836_s2 = inlined_call_operand.vmem [shape: bf16[64,32], index: 2, kind: input, shape index: {}]   ;;  %s2837_s3 = inlined_call_operand.vmem [shape: bf16[128,32], index: 3, kind: input, shape index: {}]   ;;  %s2838_s4 = inlined_call_operand.hbm [shape: bf16[512,128], index: 4, kind: input, shape index: {}]   ;;  %s2839_s5 = inlined_call_operand.vmem [shape: bf16[128,32], index: 5, kind: input, shape index: {}]   ;;  %s2840_s6 = inlined_call_operand.vmem [shape: f32[1,32], index: 6, kind: input, shape index: {}]   ;;  %s2841_s7 = inlined_call_operand.vmem [shape: f32[1,8], index: 7, kind: input, shape index: {}]   ;;  %s2842_s8 = inlined_call_operand.vmem [shape: f32[2,1], index: 8, kind: output, shape index: {}]  }
   0x1   :  { %s27_s28 = sshll.u32 %s2342_s27, 4  ;;  %s28_s28 = int_to_ptr.vmem [resolvable:$true] %s27_s28 }
   0x2   :  { %s2328_s29 = scalar_lea.vmem %s28_s28, 4096  ;;  %p2333_p1 = scmp.lt.s32.totalorder %s28_s28, %s28_s28 }
   0x3   :  { %p2329_p0 = scmp.ne.s32.totalorder %s28_s28, %s2328_s29  ;;  %p2334_p2 = scmp.lt.s32.totalorder %s2328_s29, %s2328_s29 }
   0x5   :  { %p2335_p3 = por %p2334_p2, %p2333_p1 }
   0x7   :  { %p2336_p4 = pnand %p2335_p3, %p2329_p0 }
   0x9   :  { %2339 = shalt.err (!%p2336_p4)
}
   0xa   :  { %s2343_s30 = smov 64   ;;  %s2344_s9 = smov 4  }
   0xb   :  { %33 = dma.hbm_to_vmem [thread:$0]  %s2838_s4, 4096, %s28_s28, [#allocation3], %s2343_s30, %s2343_s30, %s2344_s9  }
   0xc   :  { %2340 = dma.done.wait [#allocation3], 4096  }
   0xd   :  { %2341 = vsyncadd [#allocation3], 4294963200  ;;  %v46_v0 = vld [vmem:[%s2834_s0 + $0x10] sm:$0xff]  ;;  %v47_v1 = vld [vmem:[%s2834_s0 + $0x18] sm:$0xff]  ;;  %vm116_vm0 = vcmask 261120   ;;  %vm574_vm4 = vcmask 1041409  }
   0xe   :  { %v54_v2 = vld [vmem:[%s2835_s1 + $0x10] sm:$0xff]  ;;  %v55_v3 = vld [vmem:[%s2835_s1 + $0x18] sm:$0xff]  ;;  %v44_v5 = vld [vmem:[%s2834_s0] sm:$0xff]  ;;  %s2347_s22 = smov 96   ;;  %vm661_vm6 = vcmask 523264   ;;  %vm663_vm7 = vcmask 785408  }
   0xf   :  { %v62_v4 = vadd.f32 %v54_v2, %v46_v0  ;;  %v45_v6 = vld [vmem:[%s2834_s0 + $0x8] sm:$0xff]  ;;  %v63_v7 = vadd.f32 %v55_v3, %v47_v1  ;;  %v52_v8 = vld [vmem:[%s2835_s1] sm:$0xff]  ;;  %v2260_v13 = vld [vmem:[%s2836_s2 + $0x10] sm:$0xff]   ;;  %vm2349_vm10 = vmmov 0   ;;  %vm1255_vm11 = vcmask 9216   ;;  %s2354_s24 = smov 2  }
  0x10   :  { %v53_v9 = vld [vmem:[%s2835_s1 + $0x8] sm:$0xff]  ;;  %v60_v11 = vadd.f32 %v52_v8, %v44_v5  ;;  %v50_v15 = vld [vmem:[%s2834_s0 + $0x30] sm:$0xff]  ;;  %2037 = vmatprep.mubr.msk.bf16.mxu1 %vm116_vm0, %v2260_v13  ;;  %v51_v18 = vld [vmem:[%s2834_s0 + $0x38] sm:$0xff]  ;;  %s2360_s17 = smov 6  }
  0x11   :  { %v1746_v10 = vclamps-f32 %v62_v4, 1.0  ;;  %v61_v12 = vadd.f32 %v53_v9, %v45_v6  ;;  %v1747_v14 = vclamps-f32 %v63_v7, 1.0  ;;  %v58_v19 = vld [vmem:[%s2835_s1 + $0x30] sm:$0xff]  ;;  %v59_v20 = vld [vmem:[%s2835_s1 + $0x38] sm:$0xff]  ;;  %v2262_v25 = vld [vmem:[%s2836_s2] sm:$0xff]  }
  0x12   :  { %v1744_v16 = vclamps-f32 %v60_v11, 1.0  ;;  %v66_v22 = vadd.f32 %v58_v19, %v50_v15  ;;  %v67_v23 = vadd.f32 %v59_v20, %v51_v18  ;;  %v48_v28 = vld [vmem:[%s2834_s0 + $0x20] sm:$0xff]  ;;  %v49_v29 = vld [vmem:[%s2834_s0 + $0x28] sm:$0xff]  ;;  %v2261_v35 = vld [vmem:[%s2836_s2 + $0x18] sm:$0xff]   ;;  %2033 = vmatprep.mubr.msk.bf16.mxu0 %vm116_vm0, %v2262_v25 }
  0x13   :  { %v1745_v17 = vclamps-f32 %v61_v12, 1.0  ;;  %v85_v21 = vpack.c.bf16 %v1747_v14, %v1746_v10  ;;  %v56_v30 = vld [vmem:[%s2835_s1 + $0x20] sm:$0xff]  ;;  %v57_v31 = vld [vmem:[%s2835_s1 + $0x28] sm:$0xff]  ;;  %v2265_v41 = vld [vmem:[%s2837_s3 + $0x18] sm:$0xff]  }
  0x14   :  { %v1750_v26 = vclamps-f32 %v66_v22, 1.0  ;;  %v1751_v27 = vclamps-f32 %v67_v23, 1.0  ;;  %v64_v32 = vadd.f32 %v56_v30, %v48_v28  ;;  %v65_v34 = vadd.f32 %v57_v31, %v49_v29  ;;  %v2263_v37 = vld [vmem:[%s2836_s2 + $0x8] sm:$0xff]   ;;  %v2266_v42 = vld [vmem:[%s2837_s3 + $0x10] sm:$0xff]   ;;  %v2267_v43 = vld [vmem:[%s2837_s3] sm:$0xff]  }
  0x15   :  { %v84_v24 = vpack.c.bf16 %v1745_v17, %v1744_v16  ;;  %2197 = vmatprep.subr.bf16.mxu1 %v85_v21  ;;  %2029 = vmatprep.subr.bf16.mxu0 %v85_v21  ;;  %v2264_v40 = vld [vmem:[%s2837_s3 + $0x8] sm:$0xff]   ;;  %v2269_v45 = vld [vmem:[%s2837_s3 + $0x38] sm:$0xff]   ;;  %v2270_v60 = vld [vmem:[%s2837_s3 + $0x20] sm:$0xff]  }
  0x16   :  { %2199 = vmatpush3.bf16.msra.mxu1 %v85_v21  ;;  %2030 = vmatpush3.bf16.msra.mxu0 %v85_v21  ;;  %v87_v33 = vpack.c.bf16 %v1751_v27, %v1750_v26  ;;  %v1748_v36 = vclamps-f32 %v64_v32, 1.0  ;;  %v1749_v38 = vclamps-f32 %v65_v34, 1.0  ;;  %v2268_v44 = vld [vmem:[%s2837_s3 + $0x28] sm:$0xff]   ;;  %v2271_v0 = vld [vmem:[%s2837_s3 + $0x30] sm:$0xff]   ;;  %v2272_v8 = vld [vmem:[#allocation2 + $0x78] sm:$0xff]   ;;  %s2345_s3 = smov 32  }
  0x17   :  { %2198 = vmatprep.subr.bf16.mxu1 %v84_v24  ;;  %2031 = vmatprep.subr.bf16.mxu0 %v84_v24  ;;  %v2273_v9 = vld [vmem:[#allocation2 + $0xf8] sm:$0xff]   ;;  %v2276_v12 = vld [vmem:[#allocation2 + $0x70] sm:$0xff]   ;;  %v2280_v16 = vld [vmem:[#allocation2 + $0x68] sm:$0xff]  }
  0x18   :  { %v86_v39 = vpack.c.bf16 %v1749_v38, %v1748_v36  ;;  %v2274_v10 = vld [vmem:[#allocation2 + $0x38] sm:$0xff]   ;;  %v2278_v14 = vld [vmem:[#allocation2 + $0x30] sm:$0xff]   ;;  %v2281_v17 = vld [vmem:[#allocation2 + $0xe8] sm:$0xff]  }
  0x19   :  { %v2275_v11 = vld [vmem:[#allocation2 + $0xb8] sm:$0xff]   ;;  %v2279_v15 = vld [vmem:[#allocation2 + $0xb0] sm:$0xff]   ;;  %v2282_v18 = vld [vmem:[#allocation2 + $0x28] sm:$0xff]  }
  0x1a   :  { %2200 = vmatpush3.bf16.msra.mxu1 %v84_v24  ;;  %2032 = vmatpush3.bf16.msra.mxu0 %v84_v24  ;;  %v2283_v19 = vld [vmem:[#allocation2 + $0xa8] sm:$0xff]   ;;  %v2284_v20 = vld [vmem:[#allocation2 + $0x60] sm:$0xff]   ;;  %v2288_v24 = vld [vmem:[#allocation2 + $0x58] sm:$0xff]  }
  0x1b   :  { %2041 = vmatprep.subr.bf16.mxu1 %v87_v33  ;;  %2053 = vmatprep.subr.bf16.mxu0 %v2265_v41  ;;  %v2285_v21 = vld [vmem:[#allocation2 + $0xe0] sm:$0xff]   ;;  %v2290_v26 = vld [vmem:[#allocation2 + $0x18] sm:$0xff]  }
  0x1c   :  { %v2286_v22 = vld [vmem:[#allocation2 + $0x20] sm:$0xff]   ;;  %v2291_v27 = vld [vmem:[#allocation2 + $0x98] sm:$0xff]  }
  0x1d   :  { %2038 = vmatmul.mubr.msk.bf16.vlgmr.msra.gmra.mxu1 %vm116_vm0, %v2261_v35  ;;  %2034 = vmatmul.mubr.msk.bf16.vlgmr.msra.gmra.mxu0 %vm116_vm0, %v2263_v37  ;;  %v2287_v23 = vld [vmem:[#allocation2 + $0xa0] sm:$0xff]  }
  0x1e   :  { %2042 = vmatpush3.bf16.msra.mxu1 %v87_v33  ;;  %2045 = vmatprep.mubr.msk.bf16.mxu1 %vm116_vm0, %v2262_v25  ;;  %v2289_v25 = vld [vmem:[#allocation2 + $0xd8] sm:$0xff]  }
  0x1f   :  { %2043 = vmatprep.subr.bf16.mxu1 %v86_v39  ;;  %2054 = vmatpush3.bf16.msra.mxu0 %v2265_v41 }
  0x20   :  { %2055 = vmatprep.subr.bf16.mxu0 %v2266_v42 }
  0x22   :  { %2044 = vmatpush3.bf16.msra.mxu1 %v86_v39 }
  0x23   :  { %2061 = vmatprep.subr.bf16.mxu1 %v2264_v40  ;;  %2056 = vmatpush3.bf16.msra.mxu0 %v2266_v42 }
  0x24   :  { %2069 = vmatprep.subr.bf16.mxu0 %v2268_v44 }
  0x25   :  { %2046 = vmatmul.mubr.msk.bf16.vlgmr.msra.gmra.mxu1 %vm116_vm0, %v2263_v37 }
  0x26   :  { %2049 = vmatprep.mubr.msk.bf16.mxu1 %vm116_vm0, %v2260_v13  ;;  %2062 = vmatpush3.bf16.msra.mxu1 %v2264_v40  ;;  %v2277_v13 = vld [vmem:[#allocation2 + $0xf0] sm:$0xff]  }
  0x27   :  { %2063 = vmatprep.subr.bf16.mxu1 %v2267_v43 }
  0x2a   :  { %2064 = vmatpush3.bf16.msra.mxu1 %v2267_v43 }
  0x2b   :  { %2077 = vmatprep.subr.bf16.mxu1 %v2269_v45 }
  0x2d   :  { %2050 = vmatmul.mubr.msk.bf16.gmra.mxu1 %vm116_vm0, %v2261_v35 }
  0xdd   :  { %v2039_v46 = vpop.f32.mrf.mxu1  ;;  %v2035_v47 = vpop.f32.mrf.mxu0 }
  0xdf   :  { %v179_v48 = vpop.f32.mrf.mxu1  ;;  %v163_v49 = vpop.f32.mrf.mxu0 }
  0xe1   :  { %v2040_v50 = vpop.f32.mrf.mxu1  ;;  %v2036_v51 = vpop.f32.mrf.mxu0 }
  0xe2   :  { %v277_v52 = vpack.c.bf16 %v2036_v51, %v2035_v47  ;;  %v486_v1 = vpack.c.bf16 %v2040_v50, %v2039_v46 }
  0xe3   :  { %v182_v53 = vpop.f32.mrf.mxu1  ;;  %v166_v54 = vpop.f32.mrf.mxu0 }
  0xe4   :  { %v275_v55 = vpack.c.bf16 %v166_v54, %v163_v49  ;;  %2057 = vmatprep.mubr.msk.bf16.mxu0 %vm116_vm0, %v277_v52  ;;  %v413_v61 = vpack.c.bf16 %v182_v53, %v179_v48 }
  0xe5   :  { %v2047_v56 = vpop.f32.mrf.mxu1 }
  0xe6   :  { %2065 = vmatprep.mubr.msk.bf16.mxu1 %vm116_vm0, %v275_v55 }
  0xe7   :  { %v228_v57 = vpop.f32.mrf.mxu1 }
  0xe9   :  { %v2048_v58 = vpop.f32.mrf.mxu1 }
  0xea   :  { %v278_v59 = vpack.c.bf16 %v2048_v58, %v2047_v56 }
  0xeb   :  { %v231_v62 = vpop.f32.mrf.mxu1 }
  0xec   :  { %v276_v63 = vpack.c.bf16 %v231_v62, %v228_v57  ;;  %2058 = vmatmul.mubr.msk.bf16.vlgmr.msra.gmra.mxu0 %vm116_vm0, %v278_v59 }
  0xed   :  { %v2051_v2 = vpop.f32.mrf.mxu1  ;;  %2073 = vmatprep.mubr.msk.bf16.mxu0 %vm116_vm0, %v413_v61  ;;  %2070 = vmatpush3.bf16.msra.mxu0 %v2268_v44  ;;  %v2293_v61 = vld [vmem:[#allocation2 + $0xd0] sm:$0xff]  }
  0xee   :  { %2066 = vmatmul.mubr.msk.bf16.vlgmr.msra.gmra.mxu1 %vm116_vm0, %v276_v63  ;;  %2071 = vmatprep.subr.bf16.mxu0 %v2270_v60  ;;  %v2294_v63 = vld [vmem:[#allocation2 + $0x10] sm:$0xff]  }
  0xef   :  { %v244_v3 = vpop.f32.mrf.mxu1  ;;  %2078 = vmatpush3.bf16.msra.mxu1 %v2269_v45  ;;  %2081 = vmatprep.mubr.msk.bf16.mxu1 %vm116_vm0, %v486_v1 }
  0xf0   :  { %2079 = vmatprep.subr.bf16.mxu1 %v2271_v0 }
  0xf1   :  { %v2052_v4 = vpop.f32.mrf.mxu1  ;;  %2072 = vmatpush3.bf16.msra.mxu0 %v2270_v60  ;;  %v2292_v60 = vld [vmem:[#allocation2 + $0x50] sm:$0xff]  }
  0xf2   :  { %v487_v6 = vpack.c.bf16 %v2052_v4, %v2051_v2  ;;  %1932 = vmatprep.subr.bf16.mxu0 %v2272_v8 }
  0xf3   :  { %v247_v5 = vpop.f32.mrf.mxu1  ;;  %2080 = vmatpush3.bf16.msra.mxu1 %v2271_v0  ;;  %v2295_v0 = vld [vmem:[#allocation2 + $0x90] sm:$0xff]  }
  0xf4   :  { %v414_v7 = vpack.c.bf16 %v247_v5, %v244_v3  ;;  %1954 = vmatprep.subr.bf16.mxu1 %v2273_v9 }
  0xf6   :  { %2074 = vmatmul.mubr.msk.bf16.vlgmr.msra.gmra.mxu0 %vm116_vm0, %v414_v7  ;;  %2082 = vmatmul.mubr.msk.bf16.vlgmr.msra.gmra.mxu1 %vm116_vm0, %v487_v6 }
  0xf7   :  { %1933 = vmatpush3.bf16.msra.mxu0 %v2274_v10  ;;  %1955 = vmatpush3.bf16.msra.mxu1 %v2275_v11  ;;  %v2296_v11 = vld [vmem:[#allocation2 + $0x48] sm:$0xff]  }
  0xf8   :  { %1934 = vmatprep.subr.bf16.mxu0 %v2276_v12  ;;  %1956 = vmatprep.subr.bf16.mxu1 %v2277_v13  ;;  %v2297_v12 = vld [vmem:[#allocation2 + $0xc8] sm:$0xff]  }
  0xf9   :  { %v2298_v13 = vld [vmem:[#allocation2 + $0x8] sm:$0xff]  }
  0xfb   :  { %1935 = vmatpush3.bf16.msra.mxu0 %v2278_v14  ;;  %1957 = vmatpush3.bf16.msra.mxu1 %v2279_v15 }
  0xfc   :  { %1936 = vmatprep.subr.bf16.mxu0 %v2280_v16  ;;  %1958 = vmatprep.subr.bf16.mxu1 %v2281_v17 }
  0xff   :  { %1937 = vmatpush3.bf16.msra.mxu0 %v2282_v18  ;;  %1959 = vmatpush3.bf16.msra.mxu1 %v2283_v19  ;;  %v2299_v18 = vld [vmem:[#allocation2 + $0x88] sm:$0xff]  }
 0x100   :  { %1938 = vmatprep.subr.bf16.mxu0 %v2284_v20  ;;  %1960 = vmatprep.subr.bf16.mxu1 %v2285_v21 }
 0x103   :  { %1939 = vmatpush3.bf16.msra.mxu0 %v2286_v22  ;;  %1961 = vmatpush3.bf16.msra.mxu1 %v2287_v23 }
 0x104   :  { %1940 = vmatprep.subr.bf16.mxu0 %v2288_v24  ;;  %1962 = vmatprep.subr.bf16.mxu1 %v2289_v25 }
 0x107   :  { %1941 = vmatpush3.bf16.msra.mxu0 %v2290_v26  ;;  %1963 = vmatpush3.bf16.msra.mxu1 %v2291_v27 }
 0x108   :  { %1942 = vmatprep.subr.bf16.mxu0 %v2292_v60  ;;  %1964 = vmatprep.subr.bf16.mxu1 %v2293_v61  ;;  %v2346_v60 = vmov 0.0  }
 0x10b   :  { %1943 = vmatpush3.bf16.msra.mxu0 %v2294_v63  ;;  %1965 = vmatpush3.bf16.msra.mxu1 %v2295_v0 }
 0x10c   :  { %1944 = vmatprep.subr.bf16.mxu0 %v2296_v11  ;;  %1966 = vmatprep.subr.bf16.mxu1 %v2297_v12 }
 0x10f   :  { %1945 = vmatpush3.bf16.msra.mxu0 %v2298_v13  ;;  %1967 = vmatpush3.bf16.msra.mxu1 %v2299_v18 }
 0x1ac   :  { %v2059_v28 = vpop.f32.mrf.mxu0 }
 0x1ae   :  { %v331_v29 = vpop.f32.mrf.mxu0  ;;  %v2067_v30 = vpop.f32.mrf.mxu1 }
 0x1af   :  { %v407_v36 = vadd.f32 %v2067_v30, %v2059_v28 }
 0x1b0   :  { %v2060_v31 = vpop.f32.mrf.mxu0  ;;  %v398_v32 = vpop.f32.mrf.mxu1 }
 0x1b1   :  { %v399_v39 = vadd.f32 %v398_v32, %v331_v29 }
 0x1b2   :  { %v2068_v33 = vpop.f32.mrf.mxu1  ;;  %v334_v34 = vpop.f32.mrf.mxu0 }
 0x1b3   :  { %v410_v43 = vadd.f32 %v2068_v33, %v2060_v31 }
 0x1b4   :  { %v401_v35 = vpop.f32.mrf.mxu1 }
 0x1b5   :  { %v402_v51 = vadd.f32 %v401_v35, %v334_v34  ;;  %v2300_v35 = vld [vmem:[#allocation2 + $0x40] sm:$0xff]  }
 0x1b6   :  { %v2075_v37 = vpop.f32.mrf.mxu0  ;;  %v2083_v38 = vpop.f32.mrf.mxu1  ;;  %1946 = vmatprep.subr.bf16.mxu0 %v2300_v35  ;;  %v2348_v35 = vmov 1.0  }
 0x1b7   :  { %v484_v40 = vadd.f32 %v2075_v37, %v407_v36  ;;  %v2301_v36 = vld [vmem:[#allocation2 + $0xc0] sm:$0xff]  }
 0x1b8   :  { %v467_v41 = vpop.f32.mrf.mxu0  ;;  %v540_v42 = vpop.f32.mrf.mxu1  ;;  %v2302_v37 = vld [vmem:[#allocation2] sm:$0xff]   ;;  %1968 = vmatprep.subr.bf16.mxu1 %v2301_v36 }
 0x1b9   :  { %v557_v44 = vadd.f32 %v2083_v38, %v484_v40  ;;  %v482_v45 = vadd.f32 %v467_v41, %v399_v39  ;;  %1947 = vmatpush3.bf16.msra.mxu0 %v2302_v37 }
 0x1ba   :  { %v2076_v46 = vpop.f32.mrf.mxu0  ;;  %v2084_v50 = vpop.f32.mrf.mxu1  ;;  %2085 = vmatprep.subr.mxu0 %v2346_v60 }
 0x1bb   :  { %vm561_vm1 = vcmp.ge.f32.partialorder %v557_v44, 0.0  ;;  %v565_v47 = vmul.f32 0.2, %v557_v44  ;;  %v555_v48 = vadd.f32 %v540_v42, %v482_v45  ;;  %v485_v49 = vadd.f32 %v2076_v46, %v410_v43  ;;  %v2303_v42 = vld [vmem:[#allocation2 + $0x80] sm:$0xff]  }
 0x1bc   :  { %v470_v52 = vpop.f32.mrf.mxu0  ;;  %v543_v59 = vpop.f32.mrf.mxu1  ;;  %1969 = vmatpush3.bf16.msra.mxu1 %v2303_v42 }
 0x1bd   :  { %vm559_vm2 = vcmp.ge.f32.partialorder %v555_v48, 0.0  ;;  %v563_v53 = vmul.f32 0.2, %v555_v48  ;;  %v558_v54 = vadd.f32 %v2084_v50, %v485_v49  ;;  %v2513_v55 = vsel %vm561_vm1, %v557_v44, %v565_v47  ;;  %2120 = vmatprep.subr.mxu1 %v2346_v60 }
 0x1be   :  { %v483_v56 = vadd.f32 %v470_v52, %v402_v51  ;;  %v605_v2 = vrot.slane %v2513_v55, 5  ;;  %v599_v3 = vrot.slane %v2513_v55, 4  ;;  %v583_v4 = vrot.slane %v2513_v55, 1 }
 0x1bf   :  { %v2515_v57 = vsel %vm559_vm2, %v555_v48, %v563_v53  ;;  %vm562_vm3 = vcmp.ge.f32.partialorder %v558_v54, 0.0  ;;  %v566_v58 = vmul.f32 0.2, %v558_v54  ;;  %v589_v10 = vrot.slane %v2513_v55, 2 }
 0x1c0   :  { %v556_v62 = vadd.f32 %v543_v59, %v483_v56  ;;  %v604_v6 = vrot.slane %v2515_v57, 6  ;;  %v598_v7 = vrot.slane %v2515_v57, 5  ;;  %v582_v8 = vrot.slane %v2515_v57, 2 }
 0x1c1   :  { %v2517_v1 = vsel %vm562_vm3, %v558_v54, %v566_v58  ;;  %v577_v9 = vrot.slane %v2515_v57, 1  ;;  %v588_v25 = vrot.slane %v2515_v57, 3  ;;  %v610_v26 = vrot.slane %v2515_v57, 7 }
 0x1c2   :  { %vm560_vm5 = vcmp.ge.f32.partialorder %v556_v62, 0.0  ;;  %v564_v5 = vmul.f32 0.2, %v556_v62  ;;  %v649_v15 = vrot.slane %v2517_v1, 5  ;;  %v643_v16 = vrot.slane %v2517_v1, 4 }
 0x1c3   :  { %v627_v17 = vrot.slane %v2517_v1, 1  ;;  %v606_v23 = vsel %vm574_vm4, %v605_v2, %v604_v6  ;;  %v600_v24 = vsel %vm574_vm4, %v599_v3, %v598_v7  ;;  %v584_v38 = vsel %vm574_vm4, %v583_v4, %v582_v8 }
 0x1c4   :  { %v568_v14 = vsel %vm560_vm5, %v556_v62, %v564_v5  ;;  %v578_v39 = vsel %vm574_vm4, %v2513_v55, %v577_v9  ;;  %v633_v40 = vrot.slane %v2517_v1, 2  ;;  %v655_v41 = vrot.slane %v2517_v1, 6 }
 0x1c5   :  { %v648_v19 = vrot.slane %v568_v14, 6  ;;  %v642_v20 = vrot.slane %v568_v14, 5  ;;  %v626_v21 = vrot.slane %v568_v14, 2  ;;  %v621_v22 = vrot.slane %v568_v14, 1 }
 0x1c6   :  { %v632_v33 = vrot.slane %v568_v14, 3  ;;  %v654_v34 = vrot.slane %v568_v14, 7  ;;  %v638_v45 = vrot.slane %v568_v14, 4  ;;  %v639_v46 = vrot.slane %v2517_v1, 3 }
 0x1c7   :  { %v650_v27 = vsel %vm574_vm4, %v649_v15, %v648_v19  ;;  %v644_v28 = vsel %vm574_vm4, %v643_v16, %v642_v20  ;;  %v628_v29 = vsel %vm574_vm4, %v627_v17, %v626_v21  ;;  %v622_v30 = vsel %vm574_vm4, %v2517_v1, %v621_v22 }
 0x1c8   :  { %v2231_v31 = vpack.i.bf16 %v650_v27, %v606_v23  ;;  %v2221_v32 = vpack.i.bf16 %v644_v28, %v600_v24  ;;  %v2236_v43 = vpack.i.bf16 %v628_v29, %v584_v38  ;;  %v2226_v44 = vpack.i.bf16 %v622_v30, %v578_v39 }
 0x1c9   :  { %v595_v47 = vrot.slane %v2513_v55, 3  ;;  %v594_v48 = vrot.slane %v2515_v57, 4  ;;  %v573_v49 = vrot.slane %v2513_v55, 7  ;;  %v618_v50 = vrot.slane %v2517_v1, 7 }
 0x1ca   :  { %2232 = vrot.lane.b32.xlu1 %v2231_v31, %s2343_s30  ;;  %2222 = vrot.lane.b32.xlu0 %v2221_v32, %s2345_s3  ;;  %v634_v51 = vsel %vm574_vm4, %v633_v40, %v632_v33  ;;  %v656_v52 = vsel %vm574_vm4, %v655_v41, %v654_v34  ;;  %v640_v53 = vsel %vm574_vm4, %v639_v46, %v638_v45  ;;  %v611_v54 = vrot.slane %v2513_v55, 6 }
 0x1cb   :  { %v596_v56 = vsel %vm574_vm4, %v595_v47, %v594_v48  ;;  %v619_v58 = vsel %vm574_vm4, %v618_v50, %v568_v14  ;;  %v575_v59 = vsel %vm574_vm4, %v573_v49, %v2515_v57  ;;  %v590_v61 = vsel %vm574_vm4, %v589_v10, %v588_v25 }
 0x1cc   :  { %v612_v62 = vsel %vm574_vm4, %v611_v54, %v610_v26  ;;  %v2246_v63 = vpack.i.bf16 %v634_v51, %v590_v61  ;;  %v1032_v6 = vlaneseq  ;;  %v2350_v48 = vmov 1  }
 0x1cd   :  { %v2241_v0 = vpack.i.bf16 %v656_v52, %v612_v62  ;;  %2251 = vset.pattern.permute.xlu1 %v2350_v48  ;;  %v2351_v49 = vmov 0   ;;  %vm1737_vm1 = vcmask 1024  }
 0x1ce   :  { %2237 = vrot.lane.b32.xlu1 %v2236_v43, %s2343_s30  ;;  %2227 = vrot.lane.b32.xlu0 %v2226_v44, %s2345_s3  ;;  %v2570_v18 = vand.u32 127, %v1032_v6 }
 0x1cf   :  { %2252 = vset.pattern.permute.xlu0 %v2351_v49 }
 0x1d0   :  { %vm1820_vm8 = vcmp.eq.s32.totalorder %v2570_v18, 1  ;;  %vm1812_vm9 = vcmp.eq.s32.totalorder %v2570_v18, 0  ;;  %vm1297_vm12 = vcmp.ge.s32.totalorder %v2570_v18, 64  ;;  %vm1678_vm14 = vcmp.ge.s32.totalorder %v2570_v18, 16 }
 0x1d2   :  { %2247 = vrot.lane.b32.xlu1 %v2246_v63, %s2347_s22  ;;  %2242 = vrot.lane.b32.xlu0 %v2241_v0, %s2347_s22 }
 0x23c   :  { %v2233_v57 = vpop.permute.xlu1 %2232  ;;  %v2223_v1 = vpop.permute.xlu0 %2222 }
 0x23d   :  { %v2225_v2 = vunpack.i.h.bf16 %v2223_v1  ;;  %v2224_v3 = vunpack.i.l.bf16 %v2223_v1  ;;  %v2235_v55 = vunpack.i.h.bf16 %v2233_v57  ;;  %v2234_v9 = vunpack.i.l.bf16 %v2233_v57 }
 0x23f   :  { %v671_v12 = vsel %vm116_vm0, %v640_v53, %v2225_v2  ;;  %v665_v13 = vsel %vm116_vm0, %v596_v56, %v2224_v3 }
 0x240   :  { %v2238_v4 = vpop.permute.xlu1 %2237  ;;  %v2228_v5 = vpop.permute.xlu0 %2227  ;;  %v666_v25 = vsel %vm661_vm6, %v665_v13, %v2234_v9  ;;  %v672_v26 = vsel %vm661_vm6, %v671_v12, %v2235_v55 }
 0x241   :  { %v2230_v7 = vunpack.i.h.bf16 %v2228_v5  ;;  %v2229_v8 = vunpack.i.l.bf16 %v2228_v5  ;;  %v2240_v10 = vunpack.i.h.bf16 %v2238_v4  ;;  %v2239_v11 = vunpack.i.l.bf16 %v2238_v4 }
 0x243   :  { %v668_v14 = vsel %vm116_vm0, %v619_v58, %v2230_v7  ;;  %v660_v15 = vsel %vm116_vm0, %v575_v59, %v2229_v8 }
 0x244   :  { %v2248_v16 = vpop.permute.xlu1 %2247  ;;  %v2243_v17 = vpop.permute.xlu0 %2242  ;;  %v662_v23 = vsel %vm661_vm6, %v660_v15, %v2239_v11  ;;  %v669_v24 = vsel %vm661_vm6, %v668_v14, %v2240_v10  ;;  %v2352_v11 = vmov 1966171168   ;;  %v1283_v14 = vshrl.u32 %v1032_v6, 7  ;;  %v2741_v15 = vld [vmem:[%s2841_s7] sm:$0x1]  ;;  %v2304_v6 = vld [vmem:[%s2839_s5 + $0x38] sm:$0xff]  }
 0x245   :  { %v2250_v19 = vunpack.i.h.bf16 %v2248_v16  ;;  %v2249_v20 = vunpack.i.l.bf16 %v2248_v16  ;;  %v2245_v21 = vunpack.i.h.bf16 %v2243_v17  ;;  %v2244_v22 = vunpack.i.l.bf16 %v2243_v17 }
 0x246   :  { %v1280_v12 = vunpack.c.l.s4 %v2352_v11 }
 0x247   :  { %v664_v27 = vsel %vm663_vm7, %v662_v23, %v2249_v20  ;;  %v670_v28 = vsel %vm663_vm7, %v669_v24, %v2250_v19  ;;  %v667_v29 = vsel %vm663_vm7, %v666_v25, %v2244_v22  ;;  %v673_v30 = vsel %vm663_vm7, %v672_v26, %v2245_v21  ;;  %v2305_v24 = vld [vmem:[%s2839_s5 + $0x30] sm:$0xff]   ;;  %v2306_v25 = vld [vmem:[%s2839_s5 + $0x28] sm:$0xff]   ;;  %v2307_v26 = vld [vmem:[%s2839_s5 + $0x20] sm:$0xff]  }
 0x248   :  { %v674_v31 = vpack.c.bf16 %v664_v27, %v664_v27  ;;  %v676_v32 = vpack.c.bf16 %v670_v28, %v670_v28  ;;  %v675_v33 = vpack.c.bf16 %v667_v29, %v667_v29  ;;  %v677_v34 = vpack.c.bf16 %v673_v30, %v673_v30  ;;  %v2308_v27 = vld [vmem:[%s2839_s5 + $0x18] sm:$0xff]   ;;  %v2309_v30 = vld [vmem:[%s2839_s5 + $0x10] sm:$0xff]  }
 0x249   :  { %v1281_v13 = vunpack.c.0.s8 %v1280_v12  ;;  %v2353_v23 = vmov 3  }
 0x24a   :  { %966 = vmatprep.mubr.bf16.mxu0 %v675_v33  ;;  %1006 = vmatprep.mubr.bf16.mxu1 %v677_v34  ;;  %v2311_v33 = vld [vmem:[%s2839_s5] sm:$0xff]  }
 0x24b   :  { %967 = vmatmul.mubr.bf16.vlgmr.msra.gmra.mxu0 %v674_v31  ;;  %1007 = vmatmul.mubr.bf16.vlgmr.msra.gmra.mxu1 %v676_v32  ;;  %v2744_v19 = vsub.s32 %v1281_v13, %v1283_v14  ;;  %v2355_v31 = vmov 2   ;;  %v2310_v32 = vld [vmem:[%s2839_s5 + $0x8] sm:$0xff]   ;;  %s2358_s5 = smov 124  }
 0x24c   :  { %2086 = vmatpush3.msk.msra.mxu0 %vm1820_vm8, %v2348_v35  ;;  %2121 = vmatpush3.msk.msra.mxu1 %vm1820_vm8, %v2348_v35 }
 0x24d   :  { %2087 = vmatprep.subr.mxu0 %v2346_v60  ;;  %2122 = vmatprep.subr.mxu1 %v2346_v60 }
 0x24e   :  { %2088 = vmatpush3.msk.msra.mxu0 %vm1820_vm8, %v2348_v35  ;;  %2123 = vmatpush3.msk.msra.mxu1 %vm1820_vm8, %v2348_v35 }
 0x24f   :  { %2089 = vmatprep.subr.mxu0 %v2346_v60  ;;  %2124 = vmatprep.subr.mxu1 %v2346_v60 }
 0x250   :  { %2090 = vmatpush3.msk.msra.mxu0 %vm1820_vm8, %v2348_v35  ;;  %2125 = vmatpush3.msk.msra.mxu1 %vm1820_vm8, %v2348_v35 }
 0x251   :  { %2091 = vmatprep.subr.mxu0 %v2346_v60  ;;  %2126 = vmatprep.subr.mxu1 %v2346_v60 }
 0x252   :  { %2092 = vmatpush3.msk.msra.mxu0 %vm1820_vm8, %v2348_v35  ;;  %2127 = vmatpush3.msk.msra.mxu1 %vm1820_vm8, %v2348_v35 }
 0x253   :  { %2093 = vmatprep.subr.mxu0 %v2346_v60  ;;  %2128 = vmatprep.subr.mxu1 %v2346_v60 }
 0x254   :  { %2094 = vmatpush3.msk.msra.mxu0 %vm1820_vm8, %v2348_v35  ;;  %2129 = vmatpush3.msk.msra.mxu1 %vm1820_vm8, %v2348_v35 }
 0x255   :  { %2095 = vmatprep.subr.mxu0 %v2346_v60  ;;  %2130 = vmatprep.subr.mxu1 %v2346_v60 }
 0x256   :  { %2096 = vmatpush3.msk.msra.mxu0 %vm1820_vm8, %v2348_v35  ;;  %2131 = vmatpush3.msk.msra.mxu1 %vm1820_vm8, %v2348_v35 }
 0x257   :  { %2097 = vmatprep.subr.mxu0 %v2346_v60  ;;  %2132 = vmatprep.subr.mxu1 %v2346_v60 }
 0x258   :  { %2098 = vmatpush3.msk.msra.mxu0 %vm1820_vm8, %v2348_v35  ;;  %2133 = vmatpush3.msk.msra.mxu1 %vm1820_vm8, %v2348_v35 }
 0x259   :  { %2099 = vmatprep.subr.mxu0 %v2346_v60  ;;  %2134 = vmatprep.subr.mxu1 %v2346_v60 }
 0x25a   :  { %2100 = vmatpush3.msk.msra.mxu0 %vm1820_vm8, %v2348_v35  ;;  %2135 = vmatpush3.msk.msra.mxu1 %vm1820_vm8, %v2348_v35 }
 0x25b   :  { %2101 = vmatprep.subr.mxu0 %v2346_v60  ;;  %2136 = vmatprep.subr.mxu1 %v2346_v60 }
 0x25c   :  { %2102 = vmatpush3.msk.msra.mxu0 %vm1812_vm9, %v2348_v35  ;;  %2137 = vmatpush3.msk.msra.mxu1 %vm1812_vm9, %v2348_v35 }
 0x25d   :  { %2103 = vmatprep.subr.mxu0 %v2346_v60  ;;  %2138 = vmatprep.subr.mxu1 %v2346_v60 }
 0x25e   :  { %2104 = vmatpush3.msk.msra.mxu0 %vm1812_vm9, %v2348_v35  ;;  %2139 = vmatpush3.msk.msra.mxu1 %vm1812_vm9, %v2348_v35 }
 0x25f   :  { %2105 = vmatprep.subr.mxu0 %v2346_v60  ;;  %2140 = vmatprep.subr.mxu1 %v2346_v60 }
 0x260   :  { %2106 = vmatpush3.msk.msra.mxu0 %vm1812_vm9, %v2348_v35  ;;  %2141 = vmatpush3.msk.msra.mxu1 %vm1812_vm9, %v2348_v35 }
 0x261   :  { %2107 = vmatprep.subr.mxu0 %v2346_v60  ;;  %2142 = vmatprep.subr.mxu1 %v2346_v60 }
 0x262   :  { %2108 = vmatpush3.msk.msra.mxu0 %vm1812_vm9, %v2348_v35  ;;  %2143 = vmatpush3.msk.msra.mxu1 %vm1812_vm9, %v2348_v35 }
 0x263   :  { %2109 = vmatprep.subr.mxu0 %v2346_v60  ;;  %2144 = vmatprep.subr.mxu1 %v2346_v60 }
 0x264   :  { %2110 = vmatpush3.msk.msra.mxu0 %vm1812_vm9, %v2348_v35  ;;  %2145 = vmatpush3.msk.msra.mxu1 %vm1812_vm9, %v2348_v35 }
 0x265   :  { %2111 = vmatprep.subr.mxu0 %v2346_v60  ;;  %2146 = vmatprep.subr.mxu1 %v2346_v60 }
 0x266   :  { %2112 = vmatpush3.msk.msra.mxu0 %vm1812_vm9, %v2348_v35  ;;  %2147 = vmatpush3.msk.msra.mxu1 %vm1812_vm9, %v2348_v35 }
 0x267   :  { %2113 = vmatprep.subr.mxu0 %v2346_v60  ;;  %2148 = vmatprep.subr.mxu1 %v2346_v60 }
 0x268   :  { %2114 = vmatpush3.msk.msra.mxu0 %vm1812_vm9, %v2348_v35  ;;  %2149 = vmatpush3.msk.msra.mxu1 %vm1812_vm9, %v2348_v35 }
 0x269   :  { %2115 = vmatprep.subr.mxu0 %v2346_v60  ;;  %2150 = vmatprep.subr.mxu1 %v2346_v60 }
 0x26a   :  { %2116 = vmatpush3.msk.msra.mxu0 %vm1812_vm9, %v2348_v35  ;;  %2151 = vmatpush3.msk.msra.mxu1 %vm1812_vm9, %v2348_v35 }
 0x26b   :  { %2155 = vmatprep.subr.bf16.mxu0 %v2346_v60  ;;  %2175 = vmatprep.subr.mxu1 %v2346_v60 }
 0x26c   :  { %2117 = vmatprep.mubr.msk.f32.mxu0 %vm2349_vm10, %v2346_v60  ;;  %2152 = vmatprep.mubr.msk.f32.mxu1 %vm2349_vm10, %v2346_v60 }
 0x30b   :  { %v1948_v36 = vpop.f32.mrf.mxu0  ;;  %v1970_v37 = vpop.f32.mrf.mxu1 }
 0x30d   :  { %v1949_v38 = vpop.f32.mrf.mxu0  ;;  %v1971_v39 = vpop.f32.mrf.mxu1 }
 0x30e   :  { %v1950_v40 = vadd.f32 %v1949_v38, %v1948_v36  ;;  %v1972_v41 = vadd.f32 %v1971_v39, %v1970_v37  ;;  %v2780_v37 = vsub.s32 0, %v1283_v14 }
 0x30f   :  { %v1951_v42 = vpop.f32.mrf.mxu0  ;;  %v1973_v43 = vpop.f32.mrf.mxu1 }
 0x310   :  { %v2710_v44 = vadd.f32 %v1972_v41, %v1950_v40 }
 0x311   :  { %v1952_v45 = vpop.f32.mrf.mxu0  ;;  %v1974_v46 = vpop.f32.mrf.mxu1 }
 0x312   :  { %v1184_v47 = vmul.f32 %v2710_v44, %v2710_v44  ;;  %2118 = vmatmul.mubr.f32.vlgmr.msra.gmra.mxu0 %v2710_v44 }
 0x313   :  { %2171 = vmatprep.mubr.msk.bf16.mxu0 %vm2349_vm10, %v2346_v60  ;;  %2156 = vmatpush3.bf16.msra.mxu0 %v2304_v6 }
 0x314   :  { %2153 = vmatmul.mubr.f32.vlgmr.msra.gmra.mxu1 %v1184_v47  ;;  %2157 = vmatprep.subr.bf16.mxu0 %v2346_v60 }
 0x315   :  { %2176 = vmatpush3.msk.msra.mxu1 %vm1820_vm8, %v2348_v35  ;;  %2183 = vmatprep.mubr.msk.f32.mxu1 %vm2349_vm10, %v2346_v60 }
 0x316   :  { %2177 = vmatprep.subr.mxu1 %v2346_v60 }
 0x317   :  { %2178 = vmatpush3.msk.msra.mxu1 %vm1820_vm8, %v2348_v35  ;;  %2158 = vmatpush3.bf16.msra.mxu0 %v2305_v24 }
 0x318   :  { %2179 = vmatprep.subr.mxu1 %v2346_v60  ;;  %2159 = vmatprep.subr.bf16.mxu0 %v2346_v60 }
 0x319   :  { %2180 = vmatpush3.msk.msra.mxu1 %vm1812_vm9, %v2348_v35 }
 0x31a   :  { %2181 = vmatprep.subr.mxu1 %v2346_v60 }
 0x31b   :  { %2182 = vmatpush3.msk.msra.mxu1 %vm1812_vm9, %v2348_v35  ;;  %2160 = vmatpush3.bf16.msra.mxu0 %v2306_v25  ;;  %v2359_v25 = vmov 7  }
 0x31c   :  { %2186 = vmatprep.subr.mxu1 %v2346_v60  ;;  %2161 = vmatprep.subr.bf16.mxu0 %v2346_v60 }
 0x31f   :  { %2162 = vmatpush3.bf16.msra.mxu0 %v2307_v26 }
 0x320   :  { %2163 = vmatprep.subr.bf16.mxu0 %v2346_v60 }
 0x323   :  { %2164 = vmatpush3.bf16.msra.mxu0 %v2308_v27 }
 0x324   :  { %2165 = vmatprep.subr.bf16.mxu0 %v2346_v60 }
 0x327   :  { %2166 = vmatpush3.bf16.msra.mxu0 %v2309_v30  ;;  %v2361_v30 = vmov 6  }
 0x328   :  { %2167 = vmatprep.subr.bf16.mxu0 %v2346_v60 }
 0x32b   :  { %2168 = vmatpush3.bf16.msra.mxu0 %v2310_v32 }
 0x32c   :  { %2169 = vmatprep.subr.bf16.mxu0 %v2346_v60 }
 0x32f   :  { %2170 = vmatpush3.bf16.msra.mxu0 %v2311_v33 }
 0x3d2   :  { %v1180_v50 = vpop.f32.mrf.mxu0 }
 0x3d3   :  { %v1256_v51 = vsel %vm1255_vm11, %v1180_v50, 0.0 }
 0x3d4   :  { %v1257_v52 = vrot.slane %v1256_v51, 4  ;;  %v2119_v53 = vpop.f32.mrf.mxu0  ;;  %v1251_v54 = vpop.f32.mrf.mxu1 }
 0x3d5   :  { %v1264_v56 = vsel %vm1255_vm11, %v1251_v54, 0.0 }
 0x3d6   :  { %v1258_v58 = vadd.f32 %v1257_v52, %v1256_v51  ;;  %v1265_v59 = vrot.slane %v1264_v56, 4  ;;  %v2154_v61 = vpop.f32.mrf.mxu1 }
 0x3d8   :  { %v1259_v62 = vrot.slane %v1258_v58, 2  ;;  %v1266_v63 = vadd.f32 %v1265_v59, %v1264_v56 }
 0x3da   :  { %v1260_v0 = vadd.f32 %v1259_v62, %v1258_v58  ;;  %v1267_v57 = vrot.slane %v1266_v63, 2 }
 0x3dc   :  { %v1261_v1 = vrot.slane %v1260_v0, 1  ;;  %v1268_v2 = vadd.f32 %v1267_v57, %v1266_v63 }
 0x3de   :  { %v1262_v3 = vadd.f32 %v1261_v1, %v1260_v0  ;;  %v1269_v4 = vrot.slane %v1268_v2, 1 }
 0x3e0   :  { %v1263_v5 = vmul.f32 0.0078125, %v1262_v3  ;;  %v1270_v7 = vadd.f32 %v1269_v4, %v1268_v2 }
 0x3e2   :  { %v1272_v8 = vmul.f32 %v1263_v5, %v1263_v5  ;;  %v1271_v55 = vmul.f32 0.0078125, %v1270_v7 }
 0x3e4   :  { %v1273_v9 = vsub.f32 %v1271_v55, %v1272_v8 }
 0x3e6   :  { %v1274_v10 = vadd.f32 1e-05, %v1273_v9 }
 0x3e8   :  { %2312 = vrsqrt.f32 %v1274_v10 }
 0x3f5   :  { %v2313_v16 = vpop.eup %2312 }
 0x3f6   :  { %v1276_v17 = vmul.f32 %v2313_v16, %v2741_v15  ;;  %v2356_v16 = vmov 5  }
 0x3f8   :  { %1300 = vperm.xlu1 %2251, %v1276_v17   ;;  %v1277_v20 = vmul.f32 %v1276_v17, %v1263_v5 }
 0x3fa   :  { %v1285_v21 = vrot.slane %v1277_v20, %v2744_v19 }
 0x3fc   :  { %v1292_v22 = vrot.slane %v1285_v21, %v2744_v19  ;;  %2253 = vset.pattern.permute.xlu1 %v2353_v23 }
 0x3fe   :  { %1293 = vrot.lane.b32.xlu0 %v1292_v22, %s2354_s24  ;;  %v2357_v22 = vmov 4  }
 0x402   :  { %1308 = vperm.xlu0 %2252, %v1276_v17  }
 0x406   :  { %2256 = vset.pattern.permute.xlu0 %v2357_v22 }
 0x470   :  { %v1294_v28 = vpop.permute.xlu0 %1293 }
 0x471   :  { %v1296_v29 = vsub.f32 %v2741_v15, %v1294_v28 }
 0x473   :  { %1318 = vperm.xlu1 %2253, %v1296_v29   ;;  %v1301_v34 = vpop.permute.xlu1 %1300 }
 0x474   :  { %v1306_v40 = vrot.slane %v1301_v34, %v2780_v37 }
 0x477   :  { %2254 = vset.pattern.permute.xlu1 %v2355_v31 }
 0x478   :  { %1326 = vperm.xlu1 %2254, %v1296_v29  }
 0x47c   :  { %2255 = vset.pattern.permute.xlu1 %v2356_v16 }
 0x47d   :  { %v1309_v36 = vpop.permute.xlu0 %1308 }
 0x47e   :  { %v1314_v38 = vrot.slane %v1309_v36, %v2780_v37 }
 0x480   :  { %v1315_v41 = vsel %vm1297_vm12, %v1306_v40, %v1314_v38 }
 0x481   :  { %v1334_v46 = vmul.f32 %v1315_v41, %v2710_v44 }
 0x4ee   :  { %v1319_v39 = vpop.permute.xlu1 %1318 }
 0x4ef   :  { %v1324_v43 = vrot.slane %v1319_v39, %v2780_v37 }
 0x4f3   :  { %v1327_v42 = vpop.permute.xlu1 %1326 }
 0x4f4   :  { %v1332_v45 = vrot.slane %v1327_v42, %v2780_v37 }
 0x4f6   :  { %v1333_v47 = vsel %vm1297_vm12, %v1324_v43, %v1332_v45 }
 0x4f7   :  { %v1335_v48 = vadd.f32 %v1334_v46, %v1333_v47  ;;  %v1902_v47 = vld [vmem:[%s2840_s6] ss:$0 sm:$0xff] }
 0x4f9   :  { %v1337_v49 = vmul.f32 0.2, %v1335_v48  ;;  %vm1336_vm13 = vcmp.ge.f32.partialorder %v1335_v48, 0.0 }
 0x4fb   :  { %v1338_v50 = vsel %vm1336_vm13, %v1335_v48, %v1337_v49 }
 0x4fc   :  { %v1339_v51 = vpack.c.bf16 %v1338_v50, %v1338_v50 }
 0x4fe   :  { %2172 = vmatmul.mubr.bf16.vlgmr.msra.gmra.mxu0 %v1339_v51 }
 0x5be   :  { %v2788_v52 = vpop.f32.mrf.mxu0 }
 0x5bf   :  { %2184 = vmatmul.mubr.msk.f32.vlgmr.msra.gmra.mxu1 %vm116_vm0, %v2788_v52  ;;  %v1537_v56 = vmul.f32 %v2788_v52, %v2788_v52 }
 0x5c0   :  { %2187 = vmatpush3.msk.msra.mxu1 %vm1820_vm8, %v2348_v35  ;;  %v2173_v53 = vpop.f32.mrf.mxu0  ;;  %2194 = vmatprep.mubr.msk.f32.mxu1 %vm2349_vm10, %v2346_v60 }
 0x5c1   :  { %2188 = vmatprep.subr.mxu1 %v2346_v60 }
 0x5c2   :  { %2189 = vmatpush3.msk.msra.mxu1 %vm1820_vm8, %v2348_v35  ;;  %v1441_v44 = vpop.f32.mrf.mxu0 }
 0x5c3   :  { %2190 = vmatprep.subr.mxu1 %v2346_v60 }
 0x5c4   :  { %2191 = vmatpush3.msk.msra.mxu1 %vm1812_vm9, %v2348_v35  ;;  %v2174_v54 = vpop.f32.mrf.mxu0 }
 0x5c5   :  { %2192 = vmatprep.subr.mxu1 %v2346_v60 }
 0x5c6   :  { %2193 = vmatpush3.msk.msra.mxu1 %vm1812_vm9, %v2348_v35 }
 0x5c7   :  { %2195 = vmatmul.mubr.msk.f32.vlgmr.msra.gmra.mxu1 %vm116_vm0, %v1537_v56  ;;  %vm1727_vm0 = vcmask 254976  }
 0x67f   :  { %v1533_v58 = vpop.f32.mrf.mxu1 }
 0x680   :  { %v1611_v59 = vsel %vm1255_vm11, %v1533_v58, 0.0 }
 0x681   :  { %v1612_v61 = vrot.slane %v1611_v59, 4  ;;  %v2185_v62 = vpop.f32.mrf.mxu1 }
 0x683   :  { %v1613_v63 = vadd.f32 %v1612_v61, %v1611_v59 }
 0x685   :  { %v1614_v0 = vrot.slane %v1613_v63, 2 }
 0x687   :  { %v1615_v57 = vadd.f32 %v1614_v0, %v1613_v63  ;;  %v1607_v1 = vpop.f32.mrf.mxu1 }
 0x688   :  { %v1619_v2 = vsel %vm1255_vm11, %v1607_v1, 0.0 }
 0x689   :  { %v1616_v3 = vrot.slane %v1615_v57, 1  ;;  %v1620_v4 = vrot.slane %v1619_v2, 4  ;;  %v2196_v60 = vpop.f32.mrf.mxu1 }
 0x68b   :  { %v1621_v5 = vadd.f32 %v1620_v4, %v1619_v2  ;;  %v1617_v7 = vadd.f32 %v1616_v3, %v1615_v57 }
 0x68d   :  { %v1622_v8 = vrot.slane %v1621_v5, 2  ;;  %v1618_v55 = vmul.f32 0.03125, %v1617_v7 }
 0x68f   :  { %v1623_v35 = vadd.f32 %v1622_v8, %v1621_v5  ;;  %v1627_v11 = vmul.f32 %v1618_v55, %v1618_v55 }
 0x691   :  { %v1624_v9 = vrot.slane %v1623_v35, 1 }
 0x693   :  { %v1625_v10 = vadd.f32 %v1624_v9, %v1623_v35 }
 0x695   :  { %v1626_v12 = vmul.f32 0.03125, %v1625_v10 }
 0x697   :  { %v1628_v13 = vsub.f32 %v1626_v12, %v1627_v11 }
 0x699   :  { %v1629_v14 = vadd.f32 1e-05, %v1628_v13 }
 0x69b   :  { %2314 = vrsqrt.f32 %v1629_v14 }
 0x6a8   :  { %v2315_v17 = vpop.eup %2314 }
 0x6a9   :  { %v1638_v20 = vrot.slane %v2315_v17, %v2744_v19 }
 0x6ab   :  { %v1645_v21 = vrot.slane %v1638_v20, %v2744_v19 }
 0x6ad   :  { %1646 = vrot.lane.b32.xlu0 %v1645_v21, %s2344_s9 }
 0x71f   :  { %v1647_v23 = vpop.permute.xlu0 %1646 }
 0x720   :  { %v1649_v6 = vmul.f32 %v1647_v23, %v2741_v15 }
 0x722   :  { %v1654_v24 = vrot.slane %v1649_v6, %v2780_v37 }
 0x724   :  { %1655 = vrot.lane.b32.xlu1 %v1654_v24, %s2358_s5 }
 0x728   :  { %1680 = vperm.xlu1 %2255, %v1649_v6  }
 0x72c   :  { %2257 = vset.pattern.permute.xlu1 %v2359_v25 }
 0x796   :  { %v1656_v26 = vpop.permute.xlu1 %1655 }
 0x797   :  { %v1658_v27 = vmul.f32 %v1656_v26, %v1618_v55 }
 0x799   :  { %v1666_v28 = vrot.slane %v1658_v27, %v2744_v19 }
 0x79b   :  { %v1673_v29 = vrot.slane %v1666_v28, %v2744_v19 }
 0x79d   :  { %1674 = vrot.lane.b32.xlu0 %v1673_v29, %s2360_s17 }
 0x7a1   :  { %1688 = vperm.xlu0 %2256, %v1649_v6  }
 0x7a3   :  { %v1681_v33 = vpop.permute.xlu1 %1680 }
 0x7a4   :  { %v1686_v19 = vrot.slane %v1681_v33, %v2780_v37 }
 0x7a5   :  { %2259 = vset.pattern.permute.xlu0 %v2361_v30 }
 0x80f   :  { %v1675_v31 = vpop.permute.xlu0 %1674 }
 0x810   :  { %v1677_v32 = vsub.f32 %v2741_v15, %v1675_v31 }
 0x812   :  { %1698 = vperm.xlu1 %2257, %v1677_v32  }
 0x816   :  { %2258 = vset.pattern.permute.xlu1 %v2361_v30 }
 0x817   :  { %1706 = vperm.xlu1 %2258, %v1677_v32  }
 0x81c   :  { %v1689_v34 = vpop.permute.xlu0 %1688 }
 0x81d   :  { %v1694_v36 = vrot.slane %v1689_v34, %v2780_v37 }
 0x81f   :  { %v1695_v39 = vsel %vm1678_vm14, %v1686_v19, %v1694_v36 }
 0x820   :  { %v1714_v15 = vmul.f32 %v1695_v39, %v2788_v52 }
 0x88d   :  { %v1699_v38 = vpop.permute.xlu1 %1698 }
 0x88e   :  { %v1704_v41 = vrot.slane %v1699_v38, %v2780_v37 }
 0x892   :  { %v1707_v40 = vpop.permute.xlu1 %1706 }
 0x893   :  { %v1712_v42 = vrot.slane %v1707_v40, %v2780_v37 }
 0x895   :  { %v1713_v43 = vsel %vm1678_vm14, %v1704_v41, %v1712_v42 }
 0x896   :  { %v1715_v45 = vadd.f32 %v1714_v15, %v1713_v43 }
 0x898   :  { %vm1716_vm15 = vcmp.ge.f32.partialorder %v1715_v45, 0.0  ;;  %v1717_v46 = vmul.f32 0.2, %v1715_v45 }
 0x89a   :  { %v1718_v48 = vsel %vm1716_vm15, %v1715_v45, %v1717_v46 }
 0x89b   :  { %v1726_v18 = vmul.f32 %v1902_v47, %v1718_v48 }
 0x89d   :  { %v1728_v49 = vsel %vm1727_vm0, %v1726_v18, 0.0 }
 0x89e   :  { %1729 = vadd.xlane.f32.xlu0 %v1728_v49 }
 0x927   :  { %v1730_v50 = vpop.xlane.xlu0 %1729 }
 0x928   :  { %v1903_v51 = vmul.f32 -1.442695, %v1730_v50 }
 0x92a   :  { %2316 = vpow2.f32 %v1903_v51 }
 0x937   :  { %v2317_v53 = vpop.eup %2316 }
 0x938   :  { %v1734_v37 = vadd.f32 1.0, %v2317_v53 }
 0x93a   :  { %2318 = vrcp.f32 %v1734_v37 }
 0x947   :  { %v2319_v52 = vpop.eup %2318 }
 0x948   :  { %1738 = vst.msk [vmem:[%s2842_s8] sm:$0x3] %vm1737_vm1, %v2319_v52 }
 0x949   :  { %1743 = vsyncpa [#allocation3], 1 }

</bundles_post_ra>
